<compile_context>
chip_gen: v7x
topology: tpu7x:2x2x1
jax: 0.10.0
libtpu: 0.0.40
codegen_flags: <defaults>
</compile_context>

<pallas_src>
import functools

import jax
import jax.numpy as jnp
from jax.experimental import pallas as pl
from jax.experimental.pallas import tpu as pltpu

HIDDEN = 200          # logical hidden width of the module
HIDDEN_PAD = 256      # padded hidden width (exact MXU / vreg tiling)
OUT_PAD = 128         # single 128-lane head slab; requires 3*K <= 128


def mdn_kernel(x_ref, w1_ref, b1_ref, w2_ref, b2_ref, w3_ref, b3_ref,
               out_ref, *, ncomponents):
    K = ncomponents

    x = x_ref[...]                                  # [TB, F] bf16 (cast in wrapper)

    # Layer 1: Linear(F, 256) + ReLU  (bf16 operands, f32 accumulation)
    h1 = jnp.dot(x, w1_ref[...], preferred_element_type=jnp.float32) + b1_ref[...]
    h1 = jnp.maximum(h1, 0.0)

    # Layer 2: Linear(256, 256) + ReLU
    h2 = jnp.dot(h1.astype(jnp.bfloat16), w2_ref[...],
                 preferred_element_type=jnp.float32) + b2_ref[...]
    h2 = jnp.maximum(h2, 0.0)

    # Layer 3: Linear(256, 128)  (pi/mu/sigma packed at offsets 0, K, 2K)
    out = jnp.dot(h2.astype(jnp.bfloat16), w3_ref[...],
                  preferred_element_type=jnp.float32) + b3_ref[...]

    lane = jax.lax.broadcasted_iota(jnp.int32, out.shape, 1)

    # Softmax over the K real pi components (other lanes masked to -inf-ish).
    logits = jnp.where(lane < K, out, jnp.float32(-1e30))
    m = jnp.max(logits, axis=1, keepdims=True)
    e = jnp.exp(logits - m)
    denom = jnp.sum(e, axis=1, keepdims=True)
    pi = e / denom                                  # exact reciprocal: rows sum to 1

    # Softplus on the whole slab (only lanes [2K, 3K) are kept), stable form.
    sp = jnp.where(out > 20.0, out,
                   jnp.log1p(jnp.exp(jnp.minimum(out, 20.0))))

    # Single lane-dense unmasked store: pi | mu (raw) | softplus | (padding junk).
    out_ref[...] = jnp.where(lane < K, pi, jnp.where(lane < 2 * K, out, sp))


def _round_up(n, m):
    return ((n + m - 1) // m) * m


def _pad_params(params, ncomponents):
    """Zero-pad hidden 200->256 and the 3K head to one 128-lane slab; bf16 weights."""
    w1, b1, w2, b2, w3, b3 = params
    F, H = w1.shape
    K3 = 3 * ncomponents
    assert K3 <= OUT_PAD, "packed head layout requires 3*ncomponents <= 128"

    w1p = jnp.zeros((F, HIDDEN_PAD), jnp.float32).at[:, :H].set(w1).astype(jnp.bfloat16)
    b1p = jnp.zeros((1, HIDDEN_PAD), jnp.float32).at[:, :H].set(b1)
    w2p = jnp.zeros((HIDDEN_PAD, HIDDEN_PAD), jnp.float32).at[:H, :H].set(w2).astype(jnp.bfloat16)
    b2p = jnp.zeros((1, HIDDEN_PAD), jnp.float32).at[:, :H].set(b2)
    w3p = jnp.zeros((HIDDEN_PAD, OUT_PAD), jnp.float32).at[:H, :K3].set(w3).astype(jnp.bfloat16)
    b3p = jnp.zeros((1, OUT_PAD), jnp.float32).at[:, :K3].set(b3)
    return w1p, b1p, w2p, b2p, w3p, b3p


def mdn_forward(x, params, ncomponents, *, max_tile=512):
    """MDN forward pass. x: [B, F] f32. Returns (pi, mu, sigma), each [B, K] f32."""
    B, F = x.shape
    K = ncomponents
    assert 3 * K <= OUT_PAD, "packed head layout requires 3*ncomponents <= 128"
    w1p, b1p, w2p, b2p, w3p, b3p = _pad_params(params, K)

    # Batch tiling: aim for >= 2 grid steps (so both v7x TensorCores get work)
    # while keeping TB a multiple of 8 sublanes and capped at max_tile rows.
    half = _round_up(max(8, pl.cdiv(B, 2)), 8)
    TB = min(max_tile, half)
    B_pad = _round_up(B, TB)

    # Input cast to bf16 in the wrapper: halves x HBM read + VMEM tile.
    x = x.astype(jnp.bfloat16)
    if B_pad != B:
        x = jnp.pad(x, ((0, B_pad - B), (0, 0)))
    n_tiles = B_pad // TB

    kernel = functools.partial(mdn_kernel, ncomponents=K)
    const = lambda i: (0, 0)

    flops = 2 * B_pad * (F * HIDDEN_PAD + HIDDEN_PAD * HIDDEN_PAD + HIDDEN_PAD * OUT_PAD)
    bytes_accessed = (B_pad * F * 2 + B_pad * OUT_PAD * 4
                      + (w1p.size + w2p.size + w3p.size) * 2
                      + (b1p.size + b2p.size + b3p.size) * 4)

    out = pl.pallas_call(
        kernel,
        out_shape=jax.ShapeDtypeStruct((B_pad, OUT_PAD), jnp.float32),
        grid=(n_tiles,),
        in_specs=[
            pl.BlockSpec((TB, F), lambda i: (i, 0)),          # x: tiled over batch
            pl.BlockSpec((F, HIDDEN_PAD), const),             # weights: VMEM-resident
            pl.BlockSpec((1, HIDDEN_PAD), const),
            pl.BlockSpec((HIDDEN_PAD, HIDDEN_PAD), const),
            pl.BlockSpec((1, HIDDEN_PAD), const),
            pl.BlockSpec((HIDDEN_PAD, OUT_PAD), const),
            pl.BlockSpec((1, OUT_PAD), const),
        ],
        out_specs=pl.BlockSpec((TB, OUT_PAD), lambda i: (i, 0)),
        compiler_params=pltpu.CompilerParams(
            dimension_semantics=("parallel",),
            vmem_limit_bytes=32 << 20,
        ),
        cost_estimate=pl.CostEstimate(
            flops=flops,
            transcendentals=2 * B_pad * OUT_PAD,
            bytes_accessed=bytes_accessed,
        ),
    )(x, w1p, b1p, w2p, b2p, w3p, b3p)

    pi = out[:B, 0:K]
    mu = out[:B, K:2 * K]
    sigma = out[:B, 2 * K:3 * K]
    return pi, mu, sigma


def init_params(key, nfeatures, ncomponents, hidden=HIDDEN):
    """Deterministic init mimicking PyTorch nn.Linear default (uniform +/- 1/sqrt(fan_in))."""
    ks = jax.random.split(key, 6)

    def lin(kw, kb, fan_in, fan_out):
        bound = 1.0 / jnp.sqrt(jnp.float32(fan_in))
        w = jax.random.uniform(kw, (fan_in, fan_out), jnp.float32, -bound, bound)
        b = jax.random.uniform(kb, (1, fan_out), jnp.float32, -bound, bound)
        return w, b

    w1, b1 = lin(ks[0], ks[1], nfeatures, hidden)
    w2, b2 = lin(ks[2], ks[3], hidden, hidden)
    w3, b3 = lin(ks[4], ks[5], hidden, 3 * ncomponents)
    return (w1, b1, w2, b2, w3, b3)


def reference_forward(x, params, ncomponents):
    """Pure-JAX reference using the same bf16 matmul operands / f32 accumulation."""
    w1, b1, w2, b2, w3, b3 = params
    bf = jnp.bfloat16
    h1 = jnp.maximum(jnp.dot(x.astype(bf), w1.astype(bf),
                             preferred_element_type=jnp.float32) + b1, 0.0)
    h2 = jnp.maximum(jnp.dot(h1.astype(bf), w2.astype(bf),
                             preferred_element_type=jnp.float32) + b2, 0.0)
    out = jnp.dot(h2.astype(bf), w3.astype(bf),
                  preferred_element_type=jnp.float32) + b3
    K = ncomponents
    pi = jax.nn.softmax(out[:, :K], axis=1)
    mu = out[:, K:2 * K]
    sigma = jax.nn.softplus(out[:, 2 * K:])
    return pi, mu, sigma


if __name__ == "__main__":
    key = jax.random.PRNGKey(0)
    k_x, k_p = jax.random.split(key)

    batch = 8
    nfeatures = 32
    ncomponents = 4

    # Inputs assumed already standardized (predict() does (X - mean) / std in numpy).
    x = jax.random.normal(k_x, (batch, nfeatures), jnp.float32)
    params = init_params(k_p, nfeatures, ncomponents)

    pi, mu, sigma = mdn_forward(x, params, ncomponents)
    jax.block_until_ready((pi, mu, sigma))

    # Sanity check against the pure-JAX reference (same bf16 operand quantization;
    # tolerance covers accumulation-order differences).
    pi_r, mu_r, sigma_r = reference_forward(x, params, ncomponents)
    assert pi.shape == (batch, ncomponents)
    assert mu.shape == (batch, ncomponents)
    assert sigma.shape == (batch, ncomponents)
    assert jnp.allclose(pi, pi_r, atol=5e-3, rtol=5e-3)
    assert jnp.allclose(mu, mu_r, atol=5e-3, rtol=5e-3)
    assert jnp.allclose(sigma, sigma_r, atol=5e-3, rtol=5e-3)
    assert jnp.allclose(jnp.sum(pi, axis=1), 1.0, atol=1e-3)

    print("KERNEL_OK")
</pallas_src>

<mosaic_0001>
module attributes {stable_mosaic.version = 11 : i64} {
  func.func @mdn_kernel(%arg0: i32, %arg1: memref<8x32xbf16, #tpu.memory_space<vmem>>, %arg2: memref<32x256xbf16, #tpu.memory_space<vmem>>, %arg3: memref<1x256xf32, #tpu.memory_space<vmem>>, %arg4: memref<256x256xbf16, #tpu.memory_space<vmem>>, %arg5: memref<1x256xf32, #tpu.memory_space<vmem>>, %arg6: memref<256x128xbf16, #tpu.memory_space<vmem>>, %arg7: memref<1x128xf32, #tpu.memory_space<vmem>>, %arg8: memref<8x128xf32, #tpu.memory_space<vmem>>) attributes {dimension_semantics = [#tpu.dimension_semantics<parallel>], iteration_bounds = array<i64: 1>, scalar_prefetch = 0 : i64, scratch_operands = 0 : i64, tpu.core_type = #tpu.core_type<tc>, window_params = [{transform_indices = @transform_0, window_bounds = array<i64: 8, 32>}, {pipeline_mode = #tpu.pipeline_mode<synchronous>, transform_indices = @transform_1, window_bounds = array<i64: 32, 256>}, {pipeline_mode = #tpu.pipeline_mode<synchronous>, transform_indices = @transform_2, window_bounds = array<i64: 1, 256>}, {pipeline_mode = #tpu.pipeline_mode<synchronous>, transform_indices = @transform_3, window_bounds = array<i64: 256, 256>}, {pipeline_mode = #tpu.pipeline_mode<synchronous>, transform_indices = @transform_4, window_bounds = array<i64: 1, 256>}, {pipeline_mode = #tpu.pipeline_mode<synchronous>, transform_indices = @transform_5, window_bounds = array<i64: 256, 128>}, {pipeline_mode = #tpu.pipeline_mode<synchronous>, transform_indices = @transform_6, window_bounds = array<i64: 1, 128>}, {transform_indices = @transform_7, window_bounds = array<i64: 8, 128>}]} {
    %c0 = arith.constant 0 : index
    %c0_0 = arith.constant 0 : index
    %0 = vector.load %arg1[%c0, %c0_0] : memref<8x32xbf16, #tpu.memory_space<vmem>>, vector<8x32xbf16>
    %c0_1 = arith.constant 0 : index
    %c0_2 = arith.constant 0 : index
    %1 = vector.load %arg2[%c0_1, %c0_2] : memref<32x256xbf16, #tpu.memory_space<vmem>>, vector<32x256xbf16>
    %cst = arith.constant dense<0.000000e+00> : vector<8x256xf32>
    %2 = tpu.matmul %0, %1, %cst {dimension_numbers = #tpu.dot_dimension_numbers<[1], [0], [0], [1], [0, 0, 1, 1], [], []>} : vector<8x32xbf16>, vector<32x256xbf16>, vector<8x256xf32> -> vector<8x256xf32>
    %c0_3 = arith.constant 0 : index
    %c0_4 = arith.constant 0 : index
    %3 = vector.load %arg3[%c0_3, %c0_4] : memref<1x256xf32, #tpu.memory_space<vmem>>, vector<1x256xf32>
    %4 = vector.broadcast %3 : vector<1x256xf32> to vector<8x256xf32>
    %5 = arith.addf %2, %4 : vector<8x256xf32>
    %cst_5 = arith.constant 0.000000e+00 : f32
    %6 = vector.broadcast %cst_5 : f32 to vector<8x256xf32>
    %7 = arith.maximumf %5, %6 : vector<8x256xf32>
    %8 = arith.truncf %7 : vector<8x256xf32> to vector<8x256xbf16>
    %c0_6 = arith.constant 0 : index
    %c0_7 = arith.constant 0 : index
    %9 = vector.load %arg4[%c0_6, %c0_7] : memref<256x256xbf16, #tpu.memory_space<vmem>>, vector<256x256xbf16>
    %cst_8 = arith.constant dense<0.000000e+00> : vector<8x256xf32>
    %10 = tpu.matmul %8, %9, %cst_8 {dimension_numbers = #tpu.dot_dimension_numbers<[1], [0], [0], [1], [0, 0, 1, 1], [], []>} : vector<8x256xbf16>, vector<256x256xbf16>, vector<8x256xf32> -> vector<8x256xf32>
    %c0_9 = arith.constant 0 : index
    %c0_10 = arith.constant 0 : index
    %11 = vector.load %arg5[%c0_9, %c0_10] : memref<1x256xf32, #tpu.memory_space<vmem>>, vector<1x256xf32>
    %12 = vector.broadcast %11 : vector<1x256xf32> to vector<8x256xf32>
    %13 = arith.addf %10, %12 : vector<8x256xf32>
    %cst_11 = arith.constant 0.000000e+00 : f32
    %14 = vector.broadcast %cst_11 : f32 to vector<8x256xf32>
    %15 = arith.maximumf %13, %14 : vector<8x256xf32>
    %16 = arith.truncf %15 : vector<8x256xf32> to vector<8x256xbf16>
    %c0_12 = arith.constant 0 : index
    %c0_13 = arith.constant 0 : index
    %17 = vector.load %arg6[%c0_12, %c0_13] : memref<256x128xbf16, #tpu.memory_space<vmem>>, vector<256x128xbf16>
    %cst_14 = arith.constant dense<0.000000e+00> : vector<8x128xf32>
    %18 = tpu.matmul %16, %17, %cst_14 {dimension_numbers = #tpu.dot_dimension_numbers<[1], [0], [0], [1], [0, 0, 1, 1], [], []>} : vector<8x256xbf16>, vector<256x128xbf16>, vector<8x128xf32> -> vector<8x128xf32>
    %c0_15 = arith.constant 0 : index
    %c0_16 = arith.constant 0 : index
    %19 = vector.load %arg7[%c0_15, %c0_16] : memref<1x128xf32, #tpu.memory_space<vmem>>, vector<1x128xf32>
    %20 = vector.broadcast %19 : vector<1x128xf32> to vector<8x128xf32>
    %21 = arith.addf %18, %20 : vector<8x128xf32>
    %22 = tpu.iota {dimensions = array<i32: 1>} : vector<8x128xi32>
    %c4_i32 = arith.constant 4 : i32
    %23 = vector.broadcast %c4_i32 : i32 to vector<8x128xi32>
    %24 = arith.cmpi slt, %22, %23 : vector<8x128xi32>
    %cst_17 = arith.constant -1.000000e+30 : f32
    %25 = vector.broadcast %cst_17 : f32 to vector<8x128xf32>
    %26 = arith.select %24, %21, %25 : vector<8x128xi1>, vector<8x128xf32>
    %cst_18 = arith.constant dense<0xFF800000> : vector<8xf32>
    %27 = vector.multi_reduction <maximumf>, %26, %cst_18 [1] : vector<8x128xf32> to vector<8xf32>
    %28 = vector.shape_cast %27 : vector<8xf32> to vector<8x1xf32>
    %29 = vector.broadcast %28 : vector<8x1xf32> to vector<8x128xf32>
    %30 = arith.subf %26, %29 : vector<8x128xf32>
    %31 = math.exp %30 : vector<8x128xf32>
    %cst_19 = arith.constant dense<0.000000e+00> : vector<8xf32>
    %32 = vector.multi_reduction <add>, %31, %cst_19 [1] : vector<8x128xf32> to vector<8xf32>
    %33 = vector.shape_cast %32 : vector<8xf32> to vector<8x1xf32>
    %34 = vector.broadcast %33 : vector<8x1xf32> to vector<8x128xf32>
    %35 = arith.divf %31, %34 : vector<8x128xf32>
    %cst_20 = arith.constant 2.000000e+01 : f32
    %36 = vector.broadcast %cst_20 : f32 to vector<8x128xf32>
    %37 = arith.cmpf ogt, %21, %36 : vector<8x128xf32>
    %cst_21 = arith.constant 2.000000e+01 : f32
    %38 = vector.broadcast %cst_21 : f32 to vector<8x128xf32>
    %39 = arith.minimumf %21, %38 : vector<8x128xf32>
    %40 = math.exp %39 : vector<8x128xf32>
    %41 = math.log1p %40 : vector<8x128xf32>
    %42 = arith.select %37, %21, %41 : vector<8x128xi1>, vector<8x128xf32>
    %c4_i32_22 = arith.constant 4 : i32
    %43 = vector.broadcast %c4_i32_22 : i32 to vector<8x128xi32>
    %44 = arith.cmpi slt, %22, %43 : vector<8x128xi32>
    %c8_i32 = arith.constant 8 : i32
    %45 = vector.broadcast %c8_i32 : i32 to vector<8x128xi32>
    %46 = arith.cmpi slt, %22, %45 : vector<8x128xi32>
    %47 = arith.select %46, %21, %42 : vector<8x128xi1>, vector<8x128xf32>
    %48 = arith.select %44, %35, %47 : vector<8x128xi1>, vector<8x128xf32>
    %c0_23 = arith.constant 0 : index
    %c0_24 = arith.constant 0 : index
    %49 = vector.load %arg8[%c0_23, %c0_24] : memref<8x128xf32, #tpu.memory_space<vmem>>, vector<8x128xf32>
    tpu.vector_store %arg8[%c0_23, %c0_24], %48 {strides = array<i32>} : memref<8x128xf32, #tpu.memory_space<vmem>>, vector<8x128xf32>,
    return
  }
  func.func @transform_0(%arg0: i32) -> (i32, i32) {
    %c0_i32 = arith.constant 0 : i32
    %c0_i32_0 = arith.constant 0 : i32
    return %arg0, %c0_i32 : i32, i32
  }
  func.func @transform_1(%arg0: i32) -> (i32, i32) {
    %c0_i32 = arith.constant 0 : i32
    %c0_i32_0 = arith.constant 0 : i32
    %c0_i32_1 = arith.constant 0 : i32
    return %c0_i32, %c0_i32_0 : i32, i32
  }
  func.func @transform_2(%arg0: i32) -> (i32, i32) {
    %c0_i32 = arith.constant 0 : i32
    %c0_i32_0 = arith.constant 0 : i32
    %c0_i32_1 = arith.constant 0 : i32
    return %c0_i32, %c0_i32_0 : i32, i32
  }
  func.func @transform_3(%arg0: i32) -> (i32, i32) {
    %c0_i32 = arith.constant 0 : i32
    %c0_i32_0 = arith.constant 0 : i32
    %c0_i32_1 = arith.constant 0 : i32
    return %c0_i32, %c0_i32_0 : i32, i32
  }
  func.func @transform_4(%arg0: i32) -> (i32, i32) {
    %c0_i32 = arith.constant 0 : i32
    %c0_i32_0 = arith.constant 0 : i32
    %c0_i32_1 = arith.constant 0 : i32
    return %c0_i32, %c0_i32_0 : i32, i32
  }
  func.func @transform_5(%arg0: i32) -> (i32, i32) {
    %c0_i32 = arith.constant 0 : i32
    %c0_i32_0 = arith.constant 0 : i32
    %c0_i32_1 = arith.constant 0 : i32
    return %c0_i32, %c0_i32_0 : i32, i32
  }
  func.func @transform_6(%arg0: i32) -> (i32, i32) {
    %c0_i32 = arith.constant 0 : i32
    %c0_i32_0 = arith.constant 0 : i32
    %c0_i32_1 = arith.constant 0 : i32
    return %c0_i32, %c0_i32_0 : i32, i32
  }
  func.func @transform_7(%arg0: i32) -> (i32, i32) {
    %c0_i32 = arith.constant 0 : i32
    %c0_i32_0 = arith.constant 0 : i32
    return %arg0, %c0_i32 : i32, i32
  }
}

</mosaic_0001>

<bundles_post_ra>
// kernel: tpu_custom_call.1
= control target key start
LH: loop header
LB: loop body
LE: loop exit
PB: predicated region body
PF: predicated region fallthrough
CT: control target
= control target key end

     0   :  { %12 = vsyncpa [#allocation3], 0  ;;  %s1048_s0 = inlined_call_operand.hbm [shape: bf16[8,32], index: 0, kind: input, shape index: {}]   ;;  %s1049_s1 = inlined_call_operand.hbm [shape: bf16[32,256], index: 1, kind: input, shape index: {}]   ;;  %s1050_s2 = inlined_call_operand.vmem [shape: f32[1,256], index: 2, kind: input, shape index: {}]   ;;  %s1051_s3 = inlined_call_operand.hbm [shape: bf16[256,256], index: 3, kind: input, shape index: {}]   ;;  %s1052_s4 = inlined_call_operand.vmem [shape: f32[1,256], index: 4, kind: input, shape index: {}]   ;;  %s1053_s5 = inlined_call_operand.hbm [shape: bf16[256,128], index: 5, kind: input, shape index: {}]   ;;  %s1054_s6 = inlined_call_operand.vmem [shape: f32[1,128], index: 6, kind: input, shape index: {}]   ;;  %s1055_s7 = inlined_call_operand.hbm [shape: f32[8,128], index: 7, kind: output, shape index: {}]  }
   0x1   :  { %13 = vsyncpa [#allocation6], 0 }
   0x2   :  { %14 = vsyncpa [#allocation9], 0 }
   0x3   :  { %15 = vsyncpa [#allocation4], 0  ;;  %s921_s24 = smov [#allocation5]   ;;  %s803_s28 = scalar_lea.hbm %s1049_s1, 512 }
   0x4   :  { %s31_s25 = sshll.u32 %s921_s24, 4  ;;  %p804_p0 = scmp.ne.s32.totalorder %s1049_s1, %s803_s28  ;;  %s32_s25 = int_to_ptr.vmem [resolvable:$true] %s31_s25 }
   0x5   :  { %p807_p1 = scmp.lt.u32.totalorder %s803_s28, %s1049_s1 }
   0x7   :  { %p809_p2 = pnand %p807_p1, %p804_p0 }
   0x9   :  { %812 = shalt.err (!%p809_p2)
}
   0xa   :  { %s813_s10 = scalar_lea.vmem %s32_s25, 512  ;;  %p818_p4 = scmp.lt.s32.totalorder %s32_s25, %s32_s25 }
   0xb   :  { %p814_p3 = scmp.ne.s32.totalorder %s32_s25, %s813_s10  ;;  %p819_p5 = scmp.lt.s32.totalorder %s813_s10, %s813_s10 }
   0xd   :  { %p820_p6 = por %p819_p5, %p818_p4 }
   0xf   :  { %p821_p7 = pnand %p820_p6, %p814_p3 }
  0x11   :  { %824 = shalt.err (!%p821_p7)
}
  0x12   :  { %s922_s11 = smov 128   ;;  %s923_s12 = smov 8  }
  0x13   :  { %37 = dma.hbm_to_vmem [thread:$0]  %s1049_s1, 512, %s32_s25, [#allocation6], %s922_s11, %s922_s11, %s923_s12  }
  0x14   :  { %s924_s15 = smov [#allocation2]   ;;  %s925_s17 = smov [#allocation7]  }
  0x15   :  { %s22_s16 = sshll.u32 %s924_s15, 4  ;;  %s45_s18 = sshll.u32 %s925_s17, 4  ;;  %s23_s16 = int_to_ptr.vmem [resolvable:$true] %s22_s16  ;;  %s46_s18 = int_to_ptr.vmem [resolvable:$true] %s45_s18 }
  0x16   :  { %s825_s21 = scalar_lea.hbm %s1048_s0, 64 }
  0x17   :  { %p826_p8 = scmp.ne.s32.totalorder %s1048_s0, %s825_s21  ;;  %p829_p9 = scmp.lt.u32.totalorder %s825_s21, %s1048_s0 }
  0x19   :  { %p831_p10 = pnand %p829_p9, %p826_p8 }
  0x1b   :  { %834 = shalt.err (!%p831_p10)
}
  0x1c   :  { %s835_s1 = scalar_lea.vmem %s23_s16, 64  ;;  %p840_p12 = scmp.lt.s32.totalorder %s23_s16, %s23_s16 }
  0x1d   :  { %p836_p11 = scmp.ne.s32.totalorder %s23_s16, %s835_s1  ;;  %p841_p13 = scmp.lt.s32.totalorder %s835_s1, %s835_s1 }
  0x1f   :  { %p842_p0 = por %p841_p13, %p840_p12 }
  0x21   :  { %p843_p1 = pnand %p842_p0, %p836_p11 }
  0x23   :  { %846 = shalt.err (!%p843_p1)
}
  0x24   :  { %25 = dma.hbm_to_vmem [thread:$0]  %s1048_s0, 64, %s23_s16, [#allocation3]  }
  0x25   :  { %s847_s30 = scalar_lea.hbm %s1051_s3, 4096 }
  0x26   :  { %p848_p2 = scmp.ne.s32.totalorder %s1051_s3, %s847_s30  ;;  %p851_p3 = scmp.lt.u32.totalorder %s847_s30, %s1051_s3 }
  0x28   :  { %p853_p4 = pnand %p851_p3, %p848_p2 }
  0x2a   :  { %856 = shalt.err (!%p853_p4)
}
  0x2b   :  { %s857_s14 = scalar_lea.vmem %s46_s18, 4096  ;;  %p862_p6 = scmp.lt.s32.totalorder %s46_s18, %s46_s18 }
  0x2c   :  { %p858_p5 = scmp.ne.s32.totalorder %s46_s18, %s857_s14  ;;  %p863_p7 = scmp.lt.s32.totalorder %s857_s14, %s857_s14 }
  0x2e   :  { %p864_p8 = por %p863_p7, %p862_p6 }
  0x30   :  { %p865_p9 = pnand %p864_p8, %p858_p5 }
  0x32   :  { %868 = shalt.err (!%p865_p9)
}
  0x33   :  { %51 = dma.hbm_to_vmem [thread:$0]  %s1051_s3, 4096, %s46_s18, [#allocation6], %s922_s11, %s922_s11, %s923_s12  }
  0x34   :  { %s926_s16 = smov [#allocation8]   ;;  %s869_s21 = scalar_lea.hbm %s1053_s5, 2048 }
  0x35   :  { %s59_s17 = sshll.u32 %s926_s16, 4  ;;  %p870_p10 = scmp.ne.s32.totalorder %s1053_s5, %s869_s21  ;;  %s60_s17 = int_to_ptr.vmem [resolvable:$true] %s59_s17 }
  0x36   :  { %p873_p11 = scmp.lt.u32.totalorder %s869_s21, %s1053_s5 }
  0x38   :  { %p875_p12 = pnand %p873_p11, %p870_p10 }
  0x3a   :  { %878 = shalt.err (!%p875_p12)
}
  0x3b   :  { %s879_s1 = scalar_lea.vmem %s60_s17, 2048  ;;  %p884_p0 = scmp.lt.s32.totalorder %s60_s17, %s60_s17 }
  0x3c   :  { %p880_p13 = scmp.ne.s32.totalorder %s60_s17, %s879_s1  ;;  %p885_p1 = scmp.lt.s32.totalorder %s879_s1, %s879_s1 }
  0x3e   :  { %p886_p2 = por %p885_p1, %p884_p0 }
  0x40   :  { %p887_p3 = pnand %p886_p2, %p880_p13 }
  0x42   :  { %890 = shalt.err (!%p887_p3)
}
  0x43   :  { %s927_s3 = smov 64   ;;  %s928_s11 = smov 4  }
  0x44   :  { %65 = dma.hbm_to_vmem [thread:$0]  %s1053_s5, 2048, %s60_s17, [#allocation9], %s927_s3, %s927_s3, %s928_s11  }
  0x45   :  { %913 = dma.done.wait [#allocation3], 64  }
  0x46   :  { %914 = vsyncadd [#allocation3], 4294967232 }
  0x47   :  { %915 = dma.done.wait [#allocation6], 4608  }
  0x48   :  { %916 = vsyncadd [#allocation6], 4294962688 }
  0x49   :  { %917 = dma.done.wait [#allocation9], 2048  }
  0x4a   :  { %918 = vsyncadd [#allocation9], 4294965248  ;;  %v929_v0 = vmov 0   ;;  %v725_v1 = vld [vmem:[#allocation5 + $0x4] ss:$8 sps:$4 sm:$0xff]   ;;  %vm118_vm0 = vcmask 261120   ;;  %v88_v50 = vlaneseq }
  0x4b   :  { %154 = vmatprep.mubr.bf16.mxu0 %v929_v0  ;;  %v727_v2 = vld [vmem:[#allocation5] ss:$8 sps:$4 sm:$0xff]   ;;  %122 = vmatprep.subr.bf16.mxu0 %v725_v1  ;;  %v728_v3 = vld [vmem:[#allocation5 + $0x14] ss:$8 sps:$4 sm:$0xff]   ;;  %v730_v4 = vld [vmem:[#allocation5 + $0x10] ss:$8 sps:$4 sm:$0xff]  }
  0x4c   :  { %123 = vmatpush1.bf16.msra.mxu0 %v727_v2  ;;  %v731_v5 = vld [vmem:[#allocation7 + $0x4] ss:$8 sps:$4 sm:$0xff]   ;;  %v733_v6 = vld [vmem:[#allocation7] ss:$8 sps:$4 sm:$0xff]   ;;  %v734_v7 = vld [vmem:[#allocation7 + $0x14] ss:$8 sps:$4 sm:$0xff]  }
  0x4d   :  { %124 = vmatprep.subr.bf16.mxu0 %v728_v3  ;;  %371 = vmatprep.subr.bf16.mxu1 %v731_v5  ;;  %v81_v8 = vld [vmem:[#allocation2] sm:$0xf]  ;;  %v736_v9 = vld [vmem:[#allocation7 + $0x10] ss:$8 sps:$4 sm:$0xff]   ;;  %v737_v10 = vld [vmem:[#allocation7 + $0x24] ss:$8 sps:$4 sm:$0xff]  }
  0x4e   :  { %372 = vmatpush1.bf16.msra.mxu1 %v733_v6  ;;  %v739_v11 = vld [vmem:[#allocation7 + $0x20] ss:$8 sps:$4 sm:$0xff]   ;;  %v740_v12 = vld [vmem:[#allocation7 + $0x34] ss:$8 sps:$4 sm:$0xff]   ;;  %v742_v13 = vld [vmem:[#allocation7 + $0x30] ss:$8 sps:$4 sm:$0xff]  }
  0x4f   :  { %373 = vmatprep.subr.bf16.mxu1 %v734_v7  ;;  %v743_v14 = vld [vmem:[#allocation7 + $0x44] ss:$8 sps:$4 sm:$0xff]   ;;  %v745_v15 = vld [vmem:[#allocation7 + $0x40] ss:$8 sps:$4 sm:$0xff]   ;;  %v746_v16 = vld [vmem:[#allocation7 + $0x54] ss:$8 sps:$4 sm:$0xff]  }
  0x50   :  { %125 = vmatpush1.bf16.msra.mxu0 %v730_v4  ;;  %v748_v17 = vld [vmem:[#allocation7 + $0x50] ss:$8 sps:$4 sm:$0xff]   ;;  %v749_v18 = vld [vmem:[#allocation7 + $0x64] ss:$8 sps:$4 sm:$0xff]   ;;  %v751_v19 = vld [vmem:[#allocation7 + $0x60] ss:$8 sps:$4 sm:$0xff]  }
  0x51   :  { %v752_v20 = vld [vmem:[#allocation7 + $0x74] ss:$8 sps:$4 sm:$0xff]   ;;  %v754_v21 = vld [vmem:[#allocation7 + $0x70] ss:$8 sps:$4 sm:$0xff]   ;;  %v755_v22 = vld [vmem:[#allocation7 + $0x84] ss:$8 sps:$4 sm:$0xff]  }
  0x52   :  { %374 = vmatpush1.bf16.msra.mxu1 %v736_v9  ;;  %v757_v23 = vld [vmem:[#allocation7 + $0x80] ss:$8 sps:$4 sm:$0xff]   ;;  %v758_v24 = vld [vmem:[#allocation7 + $0x94] ss:$8 sps:$4 sm:$0xff]   ;;  %v760_v25 = vld [vmem:[#allocation7 + $0x90] ss:$8 sps:$4 sm:$0xff]  }
  0x53   :  { %643 = vmatmul.mubr.msk.bf16.vlgmr.msra.gmra.mrb[0].mxu0 %vm118_vm0, %v81_v8  ;;  %375 = vmatprep.subr.bf16.mxu1 %v737_v10  ;;  %v761_v26 = vld [vmem:[#allocation7 + $0xa4] ss:$8 sps:$4 sm:$0xff]   ;;  %v763_v27 = vld [vmem:[#allocation7 + $0xa0] ss:$8 sps:$4 sm:$0xff]   ;;  %v764_v28 = vld [vmem:[#allocation7 + $0xb4] ss:$8 sps:$4 sm:$0xff]  }
  0x54   :  { %v766_v29 = vld [vmem:[#allocation7 + $0xb0] ss:$8 sps:$4 sm:$0xff]   ;;  %v767_v30 = vld [vmem:[#allocation7 + $0xc4] ss:$8 sps:$4 sm:$0xff]   ;;  %v769_v31 = vld [vmem:[#allocation7 + $0xc0] ss:$8 sps:$4 sm:$0xff]  }
  0x55   :  { %v770_v32 = vld [vmem:[#allocation7 + $0xd4] ss:$8 sps:$4 sm:$0xff]   ;;  %v772_v33 = vld [vmem:[#allocation7 + $0xd0] ss:$8 sps:$4 sm:$0xff]   ;;  %v773_v34 = vld [vmem:[#allocation7 + $0xe4] ss:$8 sps:$4 sm:$0xff]  }
  0x56   :  { %376 = vmatpush1.bf16.msra.mxu1 %v739_v11  ;;  %v775_v35 = vld [vmem:[#allocation7 + $0xe0] ss:$8 sps:$4 sm:$0xff]   ;;  %v776_v36 = vld [vmem:[#allocation7 + $0xf4] ss:$8 sps:$4 sm:$0xff]   ;;  %v778_v37 = vld [vmem:[#allocation7 + $0xf0] ss:$8 sps:$4 sm:$0xff]  }
  0x57   :  { %377 = vmatprep.subr.bf16.mxu1 %v740_v12  ;;  %v779_v38 = vld [vmem:[#allocation8 + $0x40] sm:$0xff]   ;;  %v781_v40 = vld [vmem:[#allocation8 + $0x48] sm:$0xff]   ;;  %v783_v42 = vld [vmem:[#allocation8 + $0x50] sm:$0xff]   ;;  %v89_v51 = vshrl.u32 %v88_v50, 7 }
  0x58   :  { %v780_v39 = vld [vmem:[#allocation8] sm:$0xff]   ;;  %693 = vmatprep.subr.bf16.mxu0 %v779_v38  ;;  %v782_v41 = vld [vmem:[#allocation8 + $0x8] sm:$0xff]   ;;  %v784_v43 = vld [vmem:[#allocation8 + $0x10] sm:$0xff]  }
  0x59   :  { %694 = vmatpush3.bf16.msra.mxu0 %v780_v39  ;;  %v785_v44 = vld [vmem:[#allocation8 + $0x58] sm:$0xff]   ;;  %v787_v46 = vld [vmem:[#allocation8 + $0x60] sm:$0xff]   ;;  %v789_v48 = vld [vmem:[#allocation8 + $0x68] sm:$0xff]   ;;  %v90_v52 = vsub.s32 0, %v89_v51  ;;  %v94_v54 = vsub.s32 1, %v89_v51 }
  0x5a   :  { %378 = vmatpush1.bf16.msra.mxu1 %v742_v13  ;;  %695 = vmatprep.subr.bf16.mxu0 %v781_v40  ;;  %v786_v45 = vld [vmem:[#allocation8 + $0x18] sm:$0xff]   ;;  %v788_v47 = vld [vmem:[#allocation8 + $0x20] sm:$0xff]   ;;  %v790_v49 = vld [vmem:[#allocation8 + $0x28] sm:$0xff]  }
  0x5b   :  { %379 = vmatprep.subr.bf16.mxu1 %v743_v14  ;;  %v86_v53 = vld [vmem:[%s1050_s2] sm:$0x3]  ;;  %v791_v3 = vld [vmem:[#allocation8 + $0x70] sm:$0xff]  }
  0x5c   :  { %v91_v55 = vrot.slane %v86_v53, %v90_v52  ;;  %v95_v56 = vrot.slane %v86_v53, %v94_v54  ;;  %v792_v4 = vld [vmem:[#allocation8 + $0x30] sm:$0xff]   ;;  %v793_v5 = vld [vmem:[#allocation8 + $0x78] sm:$0xff]  }
  0x5d   :  { %696 = vmatpush3.bf16.msra.mxu0 %v782_v41  ;;  %v794_v6 = vld [vmem:[#allocation8 + $0x38] sm:$0xff]  }
  0x5e   :  { %380 = vmatpush1.bf16.msra.mxu1 %v745_v15  ;;  %697 = vmatprep.subr.bf16.mxu0 %v783_v42  ;;  %v199_v7 = vld [vmem:[%s1052_s4] sm:$0x3]  ;;  %s930_s4 = smov [#allocation10]  }
  0x5f   :  { %381 = vmatprep.subr.bf16.mxu1 %v746_v16  ;;  %v204_v8 = vrot.slane %v199_v7, %v90_v52  ;;  %v208_v9 = vrot.slane %v199_v7, %v94_v54 }
  0x61   :  { %698 = vmatpush3.bf16.msra.mxu0 %v784_v43 }
  0x62   :  { %382 = vmatpush1.bf16.msra.mxu1 %v748_v17  ;;  %699 = vmatprep.subr.bf16.mxu0 %v785_v44 }
  0x63   :  { %383 = vmatprep.subr.bf16.mxu1 %v749_v18 }
  0x65   :  { %700 = vmatpush3.bf16.msra.mxu0 %v786_v45 }
  0x66   :  { %384 = vmatpush1.bf16.msra.mxu1 %v751_v19  ;;  %701 = vmatprep.subr.bf16.mxu0 %v787_v46 }
  0x67   :  { %385 = vmatprep.subr.bf16.mxu1 %v752_v20  ;;  %v592_v20 = vand.u32 127, %v88_v50 }
  0x69   :  { %702 = vmatpush3.bf16.msra.mxu0 %v788_v47  ;;  %vm593_vm1 = vcmp.lt.s32.totalorder %v592_v20, 4  ;;  %vm618_vm2 = vcmp.lt.s32.totalorder %v592_v20, 8 }
  0x6a   :  { %386 = vmatpush1.bf16.msra.mxu1 %v754_v21  ;;  %703 = vmatprep.subr.bf16.mxu0 %v789_v48 }
  0x6b   :  { %387 = vmatprep.subr.bf16.mxu1 %v755_v22  ;;  %v676_v22 = vld [vmem:[%s1054_s6] ss:$0 sm:$0xff]  ;;  %s628_s6 = sshll.u32 %s930_s4, 4  ;;  %s629_s6 = int_to_ptr.vmem [resolvable:$true] %s628_s6 }
  0x6c   :  { %s891_s30 = scalar_lea.vmem %s629_s6, 128  ;;  %p896_p5 = scmp.lt.s32.totalorder %s629_s6, %s629_s6 }
  0x6d   :  { %704 = vmatpush3.bf16.msra.mxu0 %v790_v49  ;;  %p892_p4 = scmp.ne.s32.totalorder %s629_s6, %s891_s30  ;;  %p897_p6 = scmp.lt.s32.totalorder %s891_s30, %s891_s30 }
  0x6e   :  { %388 = vmatpush1.bf16.msra.mxu1 %v757_v23  ;;  %705 = vmatprep.subr.bf16.mxu0 %v791_v3 }
  0x6f   :  { %389 = vmatprep.subr.bf16.mxu1 %v758_v24  ;;  %p898_p7 = por %p897_p6, %p896_p5 }
  0x71   :  { %706 = vmatpush3.bf16.msra.mxu0 %v792_v4  ;;  %p899_p8 = pnand %p898_p7, %p892_p4 }
  0x72   :  { %390 = vmatpush1.bf16.msra.mxu1 %v760_v25  ;;  %707 = vmatprep.subr.bf16.mxu0 %v793_v5 }
  0x73   :  { %391 = vmatprep.subr.bf16.mxu1 %v761_v26 }
  0x75   :  { %708 = vmatpush3.bf16.msra.mxu0 %v794_v6 }
  0x76   :  { %392 = vmatpush1.bf16.msra.mxu1 %v763_v27 }
  0x77   :  { %393 = vmatprep.subr.bf16.mxu1 %v764_v28 }
  0x7a   :  { %394 = vmatpush1.bf16.msra.mxu1 %v766_v29 }
  0x7b   :  { %395 = vmatprep.subr.bf16.mxu1 %v767_v30 }
  0x7e   :  { %396 = vmatpush1.bf16.msra.mxu1 %v769_v31 }
  0x7f   :  { %397 = vmatprep.subr.bf16.mxu1 %v770_v32 }
  0x82   :  { %398 = vmatpush1.bf16.msra.mxu1 %v772_v33 }
  0x83   :  { %399 = vmatprep.subr.bf16.mxu1 %v773_v34 }
  0x86   :  { %400 = vmatpush1.bf16.msra.mxu1 %v775_v35 }
  0x87   :  { %401 = vmatprep.subr.bf16.mxu1 %v776_v36 }
  0x8a   :  { %402 = vmatpush1.bf16.msra.mxu1 %v778_v37 }
 0x126   :  { %v156_v57 = vpop.f32.mrb[0].mxu0 }
 0x127   :  { %v157_v58 = vadd.f32 %v156_v57, %v91_v55  ;;  %v158_v59 = vpop.f32.mrb[1].mxu0 }
 0x128   :  { %v159_v60 = vadd.f32 %v158_v59, %v95_v56  ;;  %v160_v61 = vpop.f32.mrb[2].mxu0 }
 0x129   :  { %v163_v62 = vmax.f32 %v157_v58, 0.0  ;;  %v161_v63 = vpop.f32.mrb[3].mxu0 }
 0x12a   :  { %v164_v0 = vmax.f32 %v159_v60, 0.0 }
 0x12b   :  { %v165_v2 = vpack.c.bf16 %v163_v62, %v163_v62 }
 0x12c   :  { %v166_v1 = vpack.c.bf16 %v164_v0, %v164_v0 }
 0x12e   :  { %403 = vmatprep.mubr.bf16.mxu1 %v166_v1 }
 0x12f   :  { %404 = vmatmul.mubr.bf16.vlgmr.msra.gmra.mrb[0].mxu1 %v165_v2 }
 0x202   :  { %v405_v10 = vpop.f32.mrb[0].mxu1 }
 0x203   :  { %v406_v11 = vadd.f32 %v405_v10, %v204_v8  ;;  %v407_v12 = vpop.f32.mrb[1].mxu1 }
 0x204   :  { %v408_v13 = vadd.f32 %v407_v12, %v208_v9  ;;  %v409_v14 = vpop.f32.mrb[2].mxu1 }
 0x205   :  { %v412_v15 = vmax.f32 %v406_v11, 0.0  ;;  %v410_v16 = vpop.f32.mrb[3].mxu1 }
 0x206   :  { %v413_v17 = vmax.f32 %v408_v13, 0.0 }
 0x207   :  { %v414_v19 = vpack.c.bf16 %v412_v15, %v412_v15 }
 0x208   :  { %v415_v18 = vpack.c.bf16 %v413_v17, %v413_v17 }
 0x20a   :  { %583 = vmatprep.mubr.bf16.mxu0 %v415_v18 }
 0x20b   :  { %584 = vmatmul.mubr.bf16.vlgmr.msra.gmra.mrb[4].mxu0 %v414_v19 }
 0x2de   :  { %v709_v21 = vpop.f32.mrb[4].mxu0 }
 0x2df   :  { %v710_v23 = vpop.f32.mrb[5].mxu0 }
 0x2e0   :  { %v711_v24 = vadd.f32 %v710_v23, %v709_v21  ;;  %v712_v25 = vpop.f32.mrb[6].mxu0 }
 0x2e1   :  { %v713_v26 = vpop.f32.mrb[7].mxu0 }
 0x2e2   :  { %v586_v27 = vadd.f32 %v711_v24, %v676_v22 }
 0x2e4   :  { %v605_v28 = vmin.f32 %v586_v27, 20.0  ;;  %v594_v29 = vsel %vm593_vm1, %v586_v27, -1e+30  ;;  %vm604_vm4 = vcmp.gt.f32.partialorder %v586_v27, 20.0 }
 0x2e5   :  { %595 = vmax.xlane.f32.xlu0 %v594_v29 }
 0x2e6   :  { %v606_v30 = vmul.f32 1.442695, %v605_v28 }
 0x2e8   :  { %795 = vpow2.f32 %v606_v30 }
 0x2f2   :  { %v796_v31 = vpop.eup %795 }
 0x2f3   :  { %v608_v32 = vadd.f32 1.0, %v796_v31  ;;  %v611_v33 = vmul.f32 -0.5, %v796_v31  ;;  %v614_v35 = vand.u32 2147483647, %v796_v31 }
 0x2f5   :  { %797 = vlog2.f32 %v608_v32  ;;  %v612_v34 = vadd.f32 1.0, %v611_v33  ;;  %vm615_vm3 = vcmp.lt.f32.partialorder %v614_v35, 0.0004427343 }
 0x2f7   :  { %v613_v38 = vmul.f32 %v796_v31, %v612_v34 }
 0x2ff   :  { %v798_v36 = vpop.eup %797 }
 0x300   :  { %v610_v37 = vmul.f32 0.6931472, %v798_v36 }
 0x302   :  { %v616_v39 = vsel %vm615_vm3, %v613_v38, %v610_v37 }
 0x303   :  { %v617_v40 = vsel %vm604_vm4, %v586_v27, %v616_v39 }
 0x304   :  { %v619_v41 = vsel %vm618_vm2, %v586_v27, %v617_v40 }
 0x372   :  { %v596_v42 = vpop.xlane.xlu0 %595 }
 0x373   :  { %v597_v43 = vsub.f32 %v594_v29, %v596_v42 }
 0x375   :  { %v598_v44 = vmul.f32 1.442695, %v597_v43 }
 0x377   :  { %799 = vpow2.f32 %v598_v44 }
 0x381   :  { %v800_v45 = vpop.eup %799 }
 0x382   :  { %600 = vadd.xlane.f32.xlu0 %v800_v45 }
 0x40f   :  { %v601_v46 = vpop.xlane.xlu0 %600 }
 0x410   :  { %801 = vrcp.f32 %v601_v46 }
 0x41a   :  { %v802_v47 = vpop.eup %801 }
 0x41b   :  { %v603_v48 = vmul.f32 %v802_v47, %v800_v45 }
 0x41d   :  { %v620_v49 = vsel %vm593_vm1, %v603_v48, %v619_v41 }
 0x41e   :  { %621 = vst [vmem:[#allocation10] sm:$0xff] %v620_v49 }
 0x41f   :  { %902 = shalt.err (!%p899_p8)
}
 0x420   :  { %s903_s10 = scalar_lea.hbm %s1055_s7, 128 }
 0x421   :  { %p904_p9 = scmp.ne.s32.totalorder %s1055_s7, %s903_s10  ;;  %p907_p10 = scmp.lt.u32.totalorder %s903_s10, %s1055_s7 }
 0x423   :  { %p909_p11 = pnand %p907_p10, %p904_p9 }
 0x425   :  { %912 = shalt.err (!%p909_p11)
}
 0x426   :  { %631 = dma.vmem_to_hbm [thread:$0]  %s629_s6, 128, %s1055_s7, [#allocation4]  }
 0x427   :  { %919 = dma.done.wait [#allocation4], 128  }
 0x428   :  { %920 = vsyncadd [#allocation4], 4294967168 }
 0x429   :  { %635 = vsyncpa [#allocation3], 1 }
 0x42a   :  { %636 = vsyncpa [#allocation6], 1 }
 0x42b   :  { %637 = vsyncpa [#allocation9], 1 }
 0x42c   :  { %638 = vsyncpa [#allocation4], 1 }

</bundles_post_ra>
